<compile_context>
chip_gen: v7x
topology: tpu7x:2x2x1
jax: 0.10.0
libtpu: 0.0.40
codegen_flags: <defaults>
</compile_context>

<pallas_src>
import functools
import math

import jax
import jax.numpy as jnp
from jax import lax
from jax.experimental import pallas as pl
from jax.experimental.pallas import tpu as pltpu

_VMEM_LIMIT = 32 * 1024 * 1024  # 32 MiB: safe on v5e/v6e/v7x


# ----------------------------------------------------------------------------
# Pallas kernels
# ----------------------------------------------------------------------------

def _matmul_epi_kernel(*refs, pre_relu, post_relu, has_residual):
    """(tm,K)@(K,tn) on the MXU (bf16 in, f32 acc) with fused epilogue:
    folded-BN affine, optional residual add, optional pre/post ReLU."""
    if has_residual:
        x_ref, w_ref, sc_ref, sh_ref, r_ref, o_ref = refs
    else:
        x_ref, w_ref, sc_ref, sh_ref, o_ref = refs
        r_ref = None
    x = x_ref[...]
    if pre_relu:
        x = jnp.maximum(x, 0.0)
    acc = jnp.dot(x.astype(jnp.bfloat16), w_ref[...],
                  preferred_element_type=jnp.float32)
    y = acc * sc_ref[...] + sh_ref[...]
    if r_ref is not None:
        y = y + r_ref[...]
    if post_relu:
        y = jnp.maximum(y, 0.0)
    o_ref[...] = y.astype(o_ref.dtype)


def _depthwise3d_kernel(x_ref, w_ref, o_ref, *, dil, pre_relu):
    """Depthwise 3x3x3 conv (stride 1) as 27 shifted multiply-accumulates (VPU),
    computed one output-depth slice at a time so the f32 accumulator stays at
    ~(Ho,Wo,C) (a handful of vregs) instead of the whole volume (which spilled
    the vreg file at 8^3 x 128). Pre-ReLU is fused into the slab read."""
    w = w_ref[...]                                  # (27, C)
    _, do, ho, wo, c = o_ref.shape
    for od in range(do):                            # static, <= 8 at this size
        acc = jnp.zeros((ho, wo, c), jnp.float32)
        for kd in range(3):
            slab = x_ref[0, od + kd * dil, :, :, :]  # (Hp, Wp, C)
            if pre_relu:
                slab = jnp.maximum(slab, 0.0)        # relu(0)==0: padding ok
            for kh in range(3):
                for kw in range(3):
                    win = slab[kh * dil:kh * dil + ho,
                               kw * dil:kw * dil + wo, :]
                    acc = acc + win * w[kd * 9 + kh * 3 + kw]
        o_ref[0, od, :, :, :] = acc.astype(o_ref.dtype)


def _sep1x1_kernel(x_ref, dwc_ref, w_ref, sc_ref, sh_ref, o_ref, *,
                   pre_relu, post_relu):
    """Fused separable conv at 1x1x1 spatial: the padded depthwise degenerates
    to a per-channel scale by its centre tap (valid for kernel 3, stride 1 at
    spatial size 1 for any dilation), followed by the pointwise matmul +
    folded BN, all in one kernel."""
    x = x_ref[...]
    if pre_relu:
        x = jnp.maximum(x, 0.0)
    h = x * dwc_ref[...]
    acc = jnp.dot(h.astype(jnp.bfloat16), w_ref[...],
                  preferred_element_type=jnp.float32)
    y = acc * sc_ref[...] + sh_ref[...]
    if post_relu:
        y = jnp.maximum(y, 0.0)
    o_ref[...] = y.astype(o_ref.dtype)


# ----------------------------------------------------------------------------
# Kernel wrappers
# ----------------------------------------------------------------------------

def matmul_bn_act(x2d, w_bf16, scale2, shift2, residual=None,
                  pre_relu=False, post_relu=False, out_dtype=jnp.float32):
    """x2d:(M,K), w:(K,N) bf16, scale/shift:(1,N) f32 -> (M,N) out_dtype."""
    M, K = x2d.shape
    N = w_bf16.shape[1]
    tm = 256 if (M > 256 and M % 256 == 0) else M
    tn = 256 if N % 256 == 0 else (128 if N % 128 == 0 else N)
    grid = (M // tm, N // tn)
    in_specs = [
        pl.BlockSpec((tm, K), lambda i, j: (i, 0)),
        pl.BlockSpec((K, tn), lambda i, j: (0, j)),
        pl.BlockSpec((1, tn), lambda i, j: (0, j)),
        pl.BlockSpec((1, tn), lambda i, j: (0, j)),
    ]
    args = [x2d, w_bf16, scale2, shift2]
    if residual is not None:
        in_specs.append(pl.BlockSpec((tm, tn), lambda i, j: (i, j)))
        args.append(residual)
    kernel = functools.partial(_matmul_epi_kernel, pre_relu=pre_relu,
                               post_relu=post_relu,
                               has_residual=residual is not None)
    return pl.pallas_call(
        kernel,
        grid=grid,
        in_specs=in_specs,
        out_specs=pl.BlockSpec((tm, tn), lambda i, j: (i, j)),
        out_shape=jax.ShapeDtypeStruct((M, N), out_dtype),
        compiler_params=pltpu.CompilerParams(
            dimension_semantics=("parallel", "parallel"),
            vmem_limit_bytes=_VMEM_LIMIT),
    )(*args)


def depthwise_conv3d_same(x, w27, *, dilation=1, pre_relu=False):
    """fixed_padding + depthwise Conv3d(k=3, groups=C), pre-ReLU fused.
    x: (N,D,H,W,C), w27: (27,C) f32 -> (N,D,H,W,C) bf16."""
    n, d, h, wdim, c = x.shape
    eff = 3 + 2 * (dilation - 1)
    pad_total = eff - 1
    pb = pad_total // 2
    pe = pad_total - pb
    xp = jnp.pad(x, ((0, 0), (pb, pe), (pb, pe), (pb, pe), (0, 0)))
    dp, hp, wp = d + pad_total, h + pad_total, wdim + pad_total
    return pl.pallas_call(
        functools.partial(_depthwise3d_kernel, dil=dilation, pre_relu=pre_relu),
        grid=(n,),
        in_specs=[
            pl.BlockSpec((1, dp, hp, wp, c), lambda i: (i, 0, 0, 0, 0)),
            pl.BlockSpec((27, c), lambda i: (0, 0)),
        ],
        out_specs=pl.BlockSpec((1, d, h, wdim, c), lambda i: (i, 0, 0, 0, 0)),
        out_shape=jax.ShapeDtypeStruct((n, d, h, wdim, c), jnp.bfloat16),
        compiler_params=pltpu.CompilerParams(
            dimension_semantics=("parallel",),
            vmem_limit_bytes=_VMEM_LIMIT),
    )(xp, w27)
    # TODO(synk): for large volumes this kernel would additionally need
    # D-tiling with halos across the grid; at this network's spatial sizes
    # batch tiling + the per-depth-slice inner loop is sufficient.


def sep_conv1x1_fused(x, sp, *, pre_relu=False, post_relu=False,
                      out_dtype=jnp.float32):
    """Single-kernel separable conv for 1x1x1 spatial inputs, gridded over
    output-channel tiles ("parallel" so both v7x TensorCores get work).
    The x/dwc specs are constant-index so only the weight tile streams."""
    n, d, h, w, c = x.shape
    assert d == 1 and h == 1 and w == 1
    x2d = x.reshape(n, c)
    cout = sp['pw_bf16'].shape[1]
    tn = 256 if cout % 256 == 0 else (128 if cout % 128 == 0 else cout)
    grid = (cout // tn,)
    y2d = pl.pallas_call(
        functools.partial(_sep1x1_kernel, pre_relu=pre_relu, post_relu=post_relu),
        grid=grid,
        in_specs=[
            pl.BlockSpec((n, c), lambda j: (0, 0)),
            pl.BlockSpec((1, c), lambda j: (0, 0)),
            pl.BlockSpec((c, tn), lambda j: (0, j)),
            pl.BlockSpec((1, tn), lambda j: (0, j)),
            pl.BlockSpec((1, tn), lambda j: (0, j)),
        ],
        out_specs=pl.BlockSpec((n, tn), lambda j: (0, j)),
        out_shape=jax.ShapeDtypeStruct((n, cout), out_dtype),
        compiler_params=pltpu.CompilerParams(
            dimension_semantics=("parallel",),
            vmem_limit_bytes=_VMEM_LIMIT),
    )(x2d, sp['dwc'], sp['pw_bf16'], sp['scale2'], sp['shift2'])
    return y2d.reshape(n, 1, 1, 1, cout)


def middle_blocks_forward(x2d, mp):
    """All 16 middle residual blocks (3 sep-convs each, 1x1x1 spatial) in ONE
    gridded pallas_call.  grid=(16 blocks, 3 stages), both 'arbitrary'; the
    (728,728) bf16 per-stage weight tile is streamed and double-buffered by the
    BlockSpec pipeline (~51 MB at HBM roofline) while the activation, the
    relu'd block input (identity skip) and the cross-block carry live in VMEM
    scratch across grid iterations.  Output spec is constant -> single final
    write-back."""
    M, c = x2d.shape
    nb, reps = int(mp['n_blocks']), int(mp['reps'])

    def kernel(x_ref, dwc_ref, pw_ref, sc_ref, sh_ref, o_ref,
               carry_ref, skip_ref, h_ref):
        i = pl.program_id(0)   # middle-block index
        j = pl.program_id(1)   # sep-conv stage within the block

        @pl.when((i == 0) & (j == 0))
        def _():
            carry_ref[...] = x_ref[...].astype(jnp.float32)

        @pl.when(j == 0)
        def _():
            cur = carry_ref[...]
            # PyTorch's leading *inplace* ReLU mutates the block input, so the
            # identity skip sees relu(block input).
            skip_ref[...] = jnp.maximum(cur, 0.0)
            h_ref[...] = cur

        h = jnp.maximum(h_ref[...], 0.0)           # every stage has a pre-ReLU
        h = h * dwc_ref[0, 0, :, :]                # depthwise centre tap
        acc = jnp.dot(h.astype(jnp.bfloat16), pw_ref[0, 0, :, :],
                      preferred_element_type=jnp.float32)
        h_ref[...] = acc * sc_ref[0, 0, :, :] + sh_ref[0, 0, :, :]

        @pl.when(j == reps - 1)
        def _():
            out = h_ref[...] + skip_ref[...]       # residual add
            carry_ref[...] = out                   # next block's input
            o_ref[...] = out.astype(o_ref.dtype)

    return pl.pallas_call(
        kernel,
        grid=(nb, reps),
        in_specs=[
            pl.BlockSpec((M, c), lambda i, j: (0, 0)),
            pl.BlockSpec((1, 1, 1, c), lambda i, j: (i, j, 0, 0)),
            pl.BlockSpec((1, 1, c, c), lambda i, j: (i, j, 0, 0)),
            pl.BlockSpec((1, 1, 1, c), lambda i, j: (i, j, 0, 0)),
            pl.BlockSpec((1, 1, 1, c), lambda i, j: (i, j, 0, 0)),
        ],
        out_specs=pl.BlockSpec((M, c), lambda i, j: (0, 0)),
        out_shape=jax.ShapeDtypeStruct((M, c), jnp.float32),
        scratch_shapes=[pltpu.VMEM((M, c), jnp.float32),   # carry (block input)
                        pltpu.VMEM((M, c), jnp.float32),   # relu'd skip
                        pltpu.VMEM((M, c), jnp.float32)],  # running activation
        compiler_params=pltpu.CompilerParams(
            dimension_semantics=("arbitrary", "arbitrary"),
            vmem_limit_bytes=_VMEM_LIMIT),
    )(x2d, mp['dwc'], mp['pw'], mp['scale'], mp['shift'])


def fused_block1x1(x2d, stages, skip, leading_relu):
    """Residual block at 1x1x1 spatial fused into one pallas_call, gridded
    ("parallel") over output-channel tiles of the LAST sep conv + skip so those
    weights are double-buffered and both v7x TensorCores get work.  Earlier
    (full-width) stage weights use constant-index specs; their recompute per
    tile is negligible (M=2 matmuls) next to the weight DMA."""
    M, cin = x2d.shape
    cout = stages[-1]['pw'].shape[1]
    has_skip = skip is not None
    if has_skip:
        tn = 256 if cout % 256 == 0 else (128 if cout % 128 == 0 else cout)
    else:
        tn = cout                       # identity skip must stay full width
        assert cin == cout
    grid = (cout // tn,)
    n_stages = len(stages)
    pre_flags = tuple(bool(s['pre_relu']) for s in stages)

    def kernel(*refs):
        x_ref = refs[0]
        pos = 1
        st_refs = []
        for _ in range(n_stages):
            st_refs.append(refs[pos:pos + 4])
            pos += 4
        if has_skip:
            skw_ref, sksc_ref, sksh_ref = refs[pos:pos + 3]
            pos += 3
        o_ref = refs[pos]

        x = x_ref[...]
        # rep[0] is the *inplace* ReLU in PyTorch: the skip path sees relu(x).
        xr = jnp.maximum(x, 0.0) if leading_relu else x
        h = x
        for flag, (dwc_ref, pw_ref, sc_ref, sh_ref) in zip(pre_flags, st_refs):
            if flag:
                h = jnp.maximum(h, 0.0)
            h = h * dwc_ref[...]                     # depthwise centre tap
            h = jnp.dot(h.astype(jnp.bfloat16), pw_ref[...],
                        preferred_element_type=jnp.float32)
            h = h * sc_ref[...] + sh_ref[...]
        if has_skip:
            sk = jnp.dot(xr.astype(jnp.bfloat16), skw_ref[...],
                         preferred_element_type=jnp.float32)
            sk = sk * sksc_ref[...] + sksh_ref[...]
        else:
            sk = xr
        o_ref[...] = (h + sk).astype(o_ref.dtype)

    in_specs = [pl.BlockSpec((M, cin), lambda j: (0, 0))]
    args = [x2d]
    for si, s in enumerate(stages):
        ci, co = s['pw'].shape
        if si == n_stages - 1:
            in_specs += [pl.BlockSpec((1, ci), lambda j: (0, 0)),
                         pl.BlockSpec((ci, tn), lambda j: (0, j)),
                         pl.BlockSpec((1, tn), lambda j: (0, j)),
                         pl.BlockSpec((1, tn), lambda j: (0, j))]
        else:
            in_specs += [pl.BlockSpec((1, ci), lambda j: (0, 0)),
                         pl.BlockSpec((ci, co), lambda j: (0, 0)),
                         pl.BlockSpec((1, co), lambda j: (0, 0)),
                         pl.BlockSpec((1, co), lambda j: (0, 0))]
        args += [s['dwc'], s['pw'], s['scale2'], s['shift2']]
    if has_skip:
        in_specs += [pl.BlockSpec((cin, tn), lambda j: (0, j)),
                     pl.BlockSpec((1, tn), lambda j: (0, j)),
                     pl.BlockSpec((1, tn), lambda j: (0, j))]
        args += [skip['w'], skip['scale2'], skip['shift2']]

    return pl.pallas_call(
        kernel,
        grid=grid,
        in_specs=in_specs,
        out_specs=pl.BlockSpec((M, tn), lambda j: (0, j)),
        out_shape=jax.ShapeDtypeStruct((M, cout), jnp.float32),
        compiler_params=pltpu.CompilerParams(
            dimension_semantics=("parallel",),
            vmem_limit_bytes=_VMEM_LIMIT),
    )(*args)


# ----------------------------------------------------------------------------
# Layer wrappers (glue: padding / reshapes in XLA; compute in Pallas kernels)
# ----------------------------------------------------------------------------

def conv3d_3x3_bn_relu(x, w_flat_bf16, scale2, shift2, *, stride, padding,
                       out_dtype=jnp.float32):
    """Dense 3x3x3 conv + folded BN + ReLU. Tap gather (im2col) is XLA glue in
    bf16; the matmul + BN + ReLU epilogue is one Pallas kernel."""
    # TODO(synk): stem outputs (32/64 channels) are below 128 lanes, so stores
    # are masked; a lane-dense output slab / in-kernel tap gather was skipped
    # for lowering robustness (the stem is a tiny fraction of total work).
    n, d, h, wdim, cin = x.shape
    cout = w_flat_bf16.shape[1]
    xp = jnp.pad(x, ((0, 0), (padding, padding), (padding, padding),
                     (padding, padding), (0, 0))).astype(jnp.bfloat16)

    def osz(length):
        return (length + 2 * padding - 3) // stride + 1

    do, ho, wo = osz(d), osz(h), osz(wdim)
    taps = []
    for kd in range(3):
        for kh in range(3):
            for kw in range(3):
                taps.append(lax.slice(
                    xp,
                    (0, kd, kh, kw, 0),
                    (n, kd + (do - 1) * stride + 1, kh + (ho - 1) * stride + 1,
                     kw + (wo - 1) * stride + 1, cin),
                    (1, stride, stride, stride, 1)))
    patches = jnp.concatenate(taps, axis=-1)            # (N,Do,Ho,Wo, 27*Cin)
    y = matmul_bn_act(patches.reshape(-1, 27 * cin), w_flat_bf16,
                      scale2, shift2, post_relu=True, out_dtype=out_dtype)
    return y.reshape(n, do, ho, wo, cout)


def separable_conv_same(x, sp, *, stride=1, dilation=1, pre_relu=False,
                        post_relu=False, residual2d=None,
                        out_dtype=jnp.float32):
    """fixed_padding + depthwise(k=3) + pointwise(+BN), ReLU/residual fused."""
    n, d, h, w, c = x.shape
    cout = sp['pw_bf16'].shape[1]
    if d == 1 and h == 1 and w == 1 and stride == 1 and residual2d is None:
        # centre-tap fast path: valid for kernel 3, stride 1, any dilation,
        # when the spatial size is exactly 1x1x1.
        return sep_conv1x1_fused(x, sp, pre_relu=pre_relu, post_relu=post_relu,
                                 out_dtype=out_dtype)
    dw = depthwise_conv3d_same(x, sp['dw27'], dilation=dilation,
                               pre_relu=pre_relu)
    if stride > 1:
        # TODO(synk): the 3 tiny stride-2 exits still compute the depthwise at
        # stride 1 and subsample (direct strided windows would require strided
        # VMEM slicing, avoided here for lowering robustness).
        dw = dw[:, ::stride, ::stride, ::stride, :]
    nb, db, hb, wb, cb = dw.shape
    y2d = matmul_bn_act(dw.reshape(-1, cb), sp['pw_bf16'], sp['scale2'],
                        sp['shift2'], residual=residual2d, post_relu=post_relu,
                        out_dtype=out_dtype)
    return y2d.reshape(nb, db, hb, wb, cout)


def block_forward(x, bp):
    rep = bp['rep']
    skip = bp['skip']
    n, d, h, w, c = x.shape
    leading_relu = rep[0][0] == 'relu'

    # Parse rep into separable-conv stages with fused pre-ReLU flags.
    sep_items = []
    pending = False
    for item in rep:
        if item[0] == 'relu':
            pending = True
        else:
            _, sp, stride, dil = item
            sep_items.append((sp, stride, dil, pending))
            pending = False
    # Every Block in this architecture ends with a separable conv, never a ReLU.
    assert not pending, "trailing ReLU before residual add is not supported"

    all_stride1 = all(s == 1 for (_, s, _, _) in sep_items)

    if d == 1 and h == 1 and w == 1 and all_stride1:
        # Fully fused single-kernel block (spatial already collapsed to 1x1x1:
        # the padded 3x3x3 depthwise degenerates to its centre tap).
        stages = [dict(pre_relu=pre, dwc=sp['dwc'], pw=sp['pw_bf16'],
                       scale2=sp['scale2'], shift2=sp['shift2'])
                  for (sp, _, _, pre) in sep_items]
        skip_arg = None
        if skip is not None:
            assert skip['stride'] == 1
            skip_arg = dict(w=skip['w_bf16'], scale2=skip['scale2'],
                            shift2=skip['shift2'])
        y2d = fused_block1x1(x.reshape(n, c), stages, skip_arg, leading_relu)
        return y2d.reshape(n, 1, 1, 1, y2d.shape[1])

    # ------------------------- generic path -------------------------
    if skip is not None:
        s = skip['stride']
        xs = x[:, ::s, ::s, ::s, :] if s > 1 else x
        sk2d = matmul_bn_act(xs.reshape(-1, c), skip['w_bf16'],
                             skip['scale2'], skip['shift2'],
                             pre_relu=leading_relu, out_dtype=jnp.float32)
    else:
        base = jnp.maximum(x, 0.0) if leading_relu else x
        sk2d = base.reshape(-1, c).astype(jnp.float32)

    hcur = x
    last = len(sep_items) - 1
    for idx, (sp, stride, dil, pre) in enumerate(sep_items):
        is_final = idx == last
        hcur = separable_conv_same(
            hcur, sp, stride=stride, dilation=dil, pre_relu=pre,
            residual2d=sk2d if is_final else None,
            out_dtype=jnp.float32 if is_final else jnp.bfloat16)
    return hcur


# ----------------------------------------------------------------------------
# Deterministic parameter init (shapes per Xception.__init__)
# ----------------------------------------------------------------------------

class _KeyGen:
    def __init__(self, key):
        self._key = key

    def __call__(self):
        self._key, sub = jax.random.split(self._key)
        return sub


def _init_bn(kg, c):
    eps = 1e-5
    gamma = 1.0 + 0.1 * jax.random.normal(kg(), (c,), jnp.float32)
    beta = 0.05 * jax.random.normal(kg(), (c,), jnp.float32)
    mean = 0.05 * jax.random.normal(kg(), (c,), jnp.float32)
    var = 1.0 + 0.1 * jax.random.uniform(kg(), (c,), jnp.float32)
    scale = gamma / jnp.sqrt(var + eps)
    shift = beta - mean * scale
    return scale, shift


def _init_conv(kg, shape, fan_in):
    return jax.random.normal(kg(), shape, jnp.float32) / math.sqrt(fan_in)


def _init_sep(kg, cin, cout, norm):
    dw = _init_conv(kg, (3, 3, 3, cin), 27)        # depthwise: groups == cin
    pw = _init_conv(kg, (cin, cout), cin)          # pointwise 1x1x1
    if norm:
        scale, shift = _init_bn(kg, cout)
    else:
        scale = jnp.ones((cout,), jnp.float32)
        shift = jnp.zeros((cout,), jnp.float32)
    return dict(
        dw27=dw.reshape(27, cin),                  # kernel-tap-major layout
        dwc=dw[1, 1, 1].reshape(1, cin),           # centre tap (1x1x1 fast path)
        pw_bf16=pw.astype(jnp.bfloat16),
        scale2=scale.reshape(1, cout).astype(jnp.float32),
        shift2=shift.reshape(1, cout).astype(jnp.float32),
    )


def _init_block(kg, inplanes, planes, reps, stride=1, dilation=1,
                start_with_relu=True, grow_first=True, is_last=False):
    rep = []
    filters = inplanes
    if grow_first:
        rep.append(('relu',))
        rep.append(('sep', _init_sep(kg, inplanes, planes, True), 1, dilation))
        filters = planes
    for _ in range(reps - 1):
        rep.append(('relu',))
        rep.append(('sep', _init_sep(kg, filters, filters, True), 1, dilation))
    if not grow_first:
        rep.append(('relu',))
        rep.append(('sep', _init_sep(kg, inplanes, planes, True), 1, dilation))
    if not start_with_relu:
        rep = rep[1:]
    if stride != 1:
        rep.append(('sep', _init_sep(kg, planes, planes, False), 2, 1))
    if stride == 1 and is_last:
        rep.append(('sep', _init_sep(kg, planes, planes, False), 1, 1))
    if planes != inplanes or stride != 1:
        w = _init_conv(kg, (inplanes, planes), inplanes)
        scale, shift = _init_bn(kg, planes)
        skip = dict(w_bf16=w.astype(jnp.bfloat16), stride=stride,
                    scale2=scale.reshape(1, planes).astype(jnp.float32),
                    shift2=shift.reshape(1, planes).astype(jnp.float32))
    else:
        skip = None
    return dict(rep=rep, skip=skip)


def _init_middle_stack(kg, n_blocks=16, c=728, reps=3):
    """Middle blocks 4..19: 16 identical (728->728) blocks of 3 sep convs each,
    stacked so one gridded Pallas kernel can stream all their weights."""
    dwc, pw, sc, sh = [], [], [], []
    for _ in range(n_blocks):
        for _ in range(reps):
            sp = _init_sep(kg, c, c, True)
            dwc.append(sp['dwc'])
            pw.append(sp['pw_bf16'])
            sc.append(sp['scale2'])
            sh.append(sp['shift2'])
    return dict(
        n_blocks=n_blocks, reps=reps,
        dwc=jnp.stack(dwc, 0).reshape(n_blocks, reps, 1, c),
        pw=jnp.stack(pw, 0).reshape(n_blocks, reps, c, c),
        scale=jnp.stack(sc, 0).reshape(n_blocks, reps, 1, c),
        shift=jnp.stack(sh, 0).reshape(n_blocks, reps, 1, c),
    )


def init_xception(key, in_chns=1):
    kg = _KeyGen(key)
    p = {}
    w1 = _init_conv(kg, (3, 3, 3, in_chns, 32), 27 * in_chns)
    p['conv1_w'] = w1.reshape(27 * in_chns, 32).astype(jnp.bfloat16)
    s1, b1 = _init_bn(kg, 32)
    p['bn1'] = (s1.reshape(1, 32), b1.reshape(1, 32))
    w2 = _init_conv(kg, (3, 3, 3, 32, 64), 27 * 32)
    p['conv2_w'] = w2.reshape(27 * 32, 64).astype(jnp.bfloat16)
    s2, b2 = _init_bn(kg, 64)
    p['bn2'] = (s2.reshape(1, 64), b2.reshape(1, 64))
    p['block1'] = _init_block(kg, 64, 128, reps=2, stride=2, start_with_relu=False)
    p['block2'] = _init_block(kg, 128, 256, reps=2, stride=2,
                              start_with_relu=True, grow_first=True)
    p['block3'] = _init_block(kg, 256, 728, reps=2, stride=2,
                              start_with_relu=True, grow_first=True, is_last=True)
    p['middle_stack'] = _init_middle_stack(kg)               # block4 .. block19
    p['block20'] = _init_block(kg, 728, 1024, reps=2, stride=1, dilation=1,
                               start_with_relu=True, grow_first=False, is_last=True)
    p['conv3'] = _init_sep(kg, 1024, 1536, True)             # dilation 2
    p['conv4'] = _init_sep(kg, 1536, 1536, True)             # dilation 2
    p['conv5'] = _init_sep(kg, 1536, 2048, True)             # dilation 2
    return p


# ----------------------------------------------------------------------------
# Forward pass (matches Xception.forward)
# ----------------------------------------------------------------------------

def xception_forward(params, x_ncdhw):
    x = jnp.transpose(x_ncdhw.astype(jnp.float32), (0, 2, 3, 4, 1))  # -> NDHWC
    x = conv3d_3x3_bn_relu(x, params['conv1_w'], *params['bn1'],
                           stride=2, padding=1, out_dtype=jnp.bfloat16)
    x = conv3d_3x3_bn_relu(x, params['conv2_w'], *params['bn2'],
                           stride=1, padding=1, out_dtype=jnp.bfloat16)
    x = block_forward(x, params['block1'])                    # f32, 4^3 x 128
    # PyTorch aliasing: low_level_feat aliases block1's output, which block2's
    # leading *inplace* ReLU mutates -> low_level_feat == relu(block1 output).
    low_level_feat = jnp.maximum(x, 0.0)
    x = block_forward(x, params['block2'])
    x = block_forward(x, params['block3'])

    # Middle blocks 4..19: one streaming Pallas kernel over all 48 sep convs.
    n, d, h, w, c = x.shape
    assert d == 1 and h == 1 and w == 1, (
        "middle-block streaming kernel assumes 1x1x1 spatial at this input size")
    x2d = middle_blocks_forward(x.reshape(n, c), params['middle_stack'])
    x = x2d.reshape(n, 1, 1, 1, c)

    x = block_forward(x, params['block20'])
    # conv3/4/5 (+ their trailing ReLUs) each run as one fused Pallas kernel.
    x = separable_conv_same(x, params['conv3'], stride=1, dilation=2,
                            post_relu=True, out_dtype=jnp.bfloat16)
    x = separable_conv_same(x, params['conv4'], stride=1, dilation=2,
                            post_relu=True, out_dtype=jnp.bfloat16)
    x = separable_conv_same(x, params['conv5'], stride=1, dilation=2,
                            post_relu=True, out_dtype=jnp.float32)
    x = jnp.transpose(x, (0, 4, 1, 2, 3))                    # NDHWC -> NCDHW
    low_level_feat = jnp.transpose(low_level_feat, (0, 4, 1, 2, 3))
    return x, low_level_feat


if __name__ == "__main__":
    key = jax.random.PRNGKey(0)
    pkey, xkey = jax.random.split(key)
    params = init_xception(pkey, in_chns=1)
    # PyTorch-convention input: (N, C, D, H, W) = (2, 1, 16, 16, 16)
    x = jax.random.normal(xkey, (2, 1, 16, 16, 16), dtype=jnp.float32)

    out, low = xception_forward(params, x)
    out = jax.block_until_ready(out)
    low = jax.block_until_ready(low)

    assert out.shape == (2, 2048, 1, 1, 1), out.shape
    assert low.shape == (2, 128, 4, 4, 4), low.shape
    assert bool(jnp.isfinite(out).all()) and bool(jnp.isfinite(low).all())
    print("KERNEL_OK")
</pallas_src>

<mosaic_0001>
module attributes {stable_mosaic.version = 11 : i64} {
  func.func @_matmul_epi_kernel(%arg0: i32, %arg1: i32, %arg2: memref<256x27xbf16, #tpu.memory_space<vmem>>, %arg3: memref<27x32xbf16, #tpu.memory_space<vmem>>, %arg4: memref<1x32xf32, #tpu.memory_space<vmem>>, %arg5: memref<1x32xf32, #tpu.memory_space<vmem>>, %arg6: memref<256x32xbf16, #tpu.memory_space<vmem>>) attributes {dimension_semantics = [#tpu.dimension_semantics<parallel>, #tpu.dimension_semantics<parallel>], iteration_bounds = array<i64: 4, 1>, scalar_prefetch = 0 : i64, scratch_operands = 0 : i64, tpu.core_type = #tpu.core_type<tc>, window_params = [{transform_indices = @transform_0, window_bounds = array<i64: 256, 27>}, {transform_indices = @transform_1, window_bounds = array<i64: 27, 32>}, {transform_indices = @transform_2, window_bounds = array<i64: 1, 32>}, {transform_indices = @transform_3, window_bounds = array<i64: 1, 32>}, {transform_indices = @transform_4, window_bounds = array<i64: 256, 32>}]} {
    %c0 = arith.constant 0 : index
    %c0_0 = arith.constant 0 : index
    %0 = vector.load %arg2[%c0, %c0_0] : memref<256x27xbf16, #tpu.memory_space<vmem>>, vector<256x27xbf16>
    %c0_1 = arith.constant 0 : index
    %c0_2 = arith.constant 0 : index
    %1 = vector.load %arg3[%c0_1, %c0_2] : memref<27x32xbf16, #tpu.memory_space<vmem>>, vector<27x32xbf16>
    %cst = arith.constant dense<0.000000e+00> : vector<256x32xf32>
    %2 = tpu.matmul %0, %1, %cst {dimension_numbers = #tpu.dot_dimension_numbers<[1], [0], [0], [1], [0, 0, 1, 1], [], []>} : vector<256x27xbf16>, vector<27x32xbf16>, vector<256x32xf32> -> vector<256x32xf32>
    %c0_3 = arith.constant 0 : index
    %c0_4 = arith.constant 0 : index
    %3 = vector.load %arg4[%c0_3, %c0_4] : memref<1x32xf32, #tpu.memory_space<vmem>>, vector<1x32xf32>
    %4 = vector.broadcast %3 : vector<1x32xf32> to vector<256x32xf32>
    %5 = arith.mulf %2, %4 : vector<256x32xf32>
    %c0_5 = arith.constant 0 : index
    %c0_6 = arith.constant 0 : index
    %6 = vector.load %arg5[%c0_5, %c0_6] : memref<1x32xf32, #tpu.memory_space<vmem>>, vector<1x32xf32>
    %7 = vector.broadcast %6 : vector<1x32xf32> to vector<256x32xf32>
    %8 = arith.addf %5, %7 : vector<256x32xf32>
    %cst_7 = arith.constant 0.000000e+00 : f32
    %9 = vector.broadcast %cst_7 : f32 to vector<256x32xf32>
    %10 = arith.maximumf %8, %9 : vector<256x32xf32>
    %11 = arith.truncf %10 : vector<256x32xf32> to vector<256x32xbf16>
    %c0_8 = arith.constant 0 : index
    %c0_9 = arith.constant 0 : index
    %12 = vector.load %arg6[%c0_8, %c0_9] : memref<256x32xbf16, #tpu.memory_space<vmem>>, vector<256x32xbf16>
    tpu.vector_store %arg6[%c0_8, %c0_9], %11 {strides = array<i32>} : memref<256x32xbf16, #tpu.memory_space<vmem>>, vector<256x32xbf16>,
    return
  }
  func.func @transform_0(%arg0: i32, %arg1: i32) -> (i32, i32) {
    %c0_i32 = arith.constant 0 : i32
    %c0_i32_0 = arith.constant 0 : i32
    return %arg0, %c0_i32 : i32, i32
  }
  func.func @transform_1(%arg0: i32, %arg1: i32) -> (i32, i32) {
    %c0_i32 = arith.constant 0 : i32
    %c0_i32_0 = arith.constant 0 : i32
    return %c0_i32, %arg1 : i32, i32
  }
  func.func @transform_2(%arg0: i32, %arg1: i32) -> (i32, i32) {
    %c0_i32 = arith.constant 0 : i32
    %c0_i32_0 = arith.constant 0 : i32
    return %c0_i32, %arg1 : i32, i32
  }
  func.func @transform_3(%arg0: i32, %arg1: i32) -> (i32, i32) {
    %c0_i32 = arith.constant 0 : i32
    %c0_i32_0 = arith.constant 0 : i32
    return %c0_i32, %arg1 : i32, i32
  }
  func.func @transform_4(%arg0: i32, %arg1: i32) -> (i32, i32) {
    %c0_i32 = arith.constant 0 : i32
    return %arg0, %arg1 : i32, i32
  }
}

</mosaic_0001>

<bundles_post_ra>
// kernel: tpu_custom_call.1
= control target key start
LH: loop header
LB: loop body
LE: loop exit
PB: predicated region body
PF: predicated region fallthrough
CT: control target
= control target key end

     0   :  { %s1261_s15 = smov 0   ;;  %s1263_s16 = smov 0   ;;  %s1481_s0 = inlined_call_operand.vmem [shape: bf16[1024,27], index: 0, kind: input, shape index: {}]   ;;  %s1482_s1 = inlined_call_operand.vmem [shape: bf16[27,32], index: 1, kind: input, shape index: {}]   ;;  %s1483_s2 = inlined_call_operand.vmem [shape: f32[1,32], index: 2, kind: input, shape index: {}]   ;;  %s1484_s3 = inlined_call_operand.vmem [shape: f32[1,32], index: 3, kind: input, shape index: {}]   ;;  %s1485_s4 = inlined_call_operand.vmem [shape: bf16[1024,32], index: 4, kind: output, shape index: {}]  }
   0x1   :  { %s1265_s17 = smov 0  }
   0x2 LB: > { %s26_s18 = sadd.s32 1, %s1229_s16  ;;  %p1003_p0 = scmp.ge.s32.totalorder %s1233_s17, 1  ;;  %s1233_s17 = sphi %s1265_s17, %s14_s17   ;;  %s1229_s16 = sphi %s1263_s16, %s1487_s16   ;;  %s1225_s15 = sphi %s1261_s15, %s1486_s15  }
   0x3   : > { %p28_p1 = scmp.ge.s32.totalorder %s26_s18, 4  ;;  %p202_p2 = scmp.lt.s32.totalorder %s1233_s17, 5 }
   0x5   : > { %s1489_s18 = smov (%p28_p1, %s26_s18), 0  ;;  %p203_p3 = pnand %p1003_p0, %p202_p2 }
   0x6   : > { %v1193_v0 = vld [vmem:[%s1482_s1] sm:$0xff] (!%p203_p3)   ;;  %vm443_vm0 = vcmask (!%p203_p3), 1044480   ;;  %v1194_v1 = vld [vmem:[%s1482_s1 + $0x8] sm:$0x3f] (!%p203_p3)   ;;  %vm444_vm1 = vcmask (!%p203_p3), 1045504   ;;  %s1004_s23 = sshll.u32 (!%p203_p3), %s1225_s15, 5 }
   0x7   : > { %206 = sbr.rel (%p203_p3) target bundleno = 270 (0x10e), region = 36  ;;  %1128 = vmatprep.subr.bf16.mxu0 (!%p203_p3), %v1193_v0  ;;  %1164 = vmatprep.subr.bf16.mxu1 (!%p203_p3), %v1193_v0  ;;  %v1235_v2 = vmov (!%p203_p3), 65535   ;;  %p242_p4 = scmp.lt.s32.totalorder (!%p203_p3), %s1004_s23, 127  ;;  %vm394_vm2 = vcmask (!%p203_p3), 220160   ;;  %v1330_v22 = vld [vmem:[%s1483_s2] ss:$0 sm:$0xff] (!%p203_p3) }
   0x8   : > { %1129 = vmatpush3.bf16.msra.mxu0 (!%p203_p3), %v1193_v0  ;;  %1166 = vmatpush3.bf16.msra.mxu1 (!%p203_p3), %v1193_v0  ;;  %v445_v3 = vsel (!%p203_p3), %vm443_vm0, 4294967295, %v1235_v2  ;;  %v1335_v24 = vld [vmem:[%s1484_s3] ss:$0 sm:$0xff] (!%p203_p3)  ;;  %vm849_vm3 = vcmask (!%p203_p3), 257024  }
   0x9   : > { %v446_v4 = vsel (!%p203_p3), %vm444_vm1, %v445_v3, 0 }
   0xa   : > { %v448_v5 = vand.u32 (!%p203_p3), %v1194_v1, %v446_v4 }
   0xc   : > { %1130 = vmatprep.subr.bf16.mxu0 (!%p203_p3), %v448_v5  ;;  %1165 = vmatprep.subr.bf16.mxu1 (!%p203_p3), %v448_v5 }
   0xd   : > { %1131 = vmatpush3.bf16.msra.mxu0 (!%p203_p3), %v448_v5  ;;  %1167 = vmatpush3.bf16.msra.mxu1 (!%p203_p3), %v448_v5 }
   0xe   : > { %s1491_s23 = smov (!%p242_p4, %s1004_s23), 127 }
   0xf   : > { %s1005_s24 = sshll.u32 %s1491_s23, 2 }
  0x10   : > { %s1293_s27 = scalar_lea.vmem %s1481_s0, %s1005_s24  ;;  %s1355_s8 = scalar_lea.vmem %s1485_s4, %s1005_s24 }
  0x11   : > { %v1195_v6 = vld [vmem:[%s1293_s27] sm:$0xff]   ;;  %v1197_v8 = vld [vmem:[%s1293_s27 + $0x8] sm:$0xff]   ;;  %v1199_v10 = vld [vmem:[%s1293_s27 + $0x10] sm:$0xff]  }
  0x12   : > { %v1196_v7 = vld [vmem:[%s1293_s27 + $0x40] sm:$0xff]   ;;  %1132 = vmatprep.mubr.msk.bf16.mxu0 %vm394_vm2, %v1195_v6  ;;  %v1198_v9 = vld [vmem:[%s1293_s27 + $0x48] sm:$0xff]   ;;  %v1200_v11 = vld [vmem:[%s1293_s27 + $0x50] sm:$0xff]  }
  0x13   : > { %1148 = vmatprep.mubr.msk.bf16.mxu1 %vm394_vm2, %v1196_v7  ;;  %1133 = vmatmul.mubr.msk.bf16.vlgmr.msra.gmra.mrb[0].mxu0 %vm394_vm2, %v1197_v8  ;;  %v1201_v12 = vld [vmem:[%s1293_s27 + $0x18] sm:$0xff]   ;;  %v1203_v14 = vld [vmem:[%s1293_s27 + $0x20] sm:$0xff]   ;;  %v1205_v16 = vld [vmem:[%s1293_s27 + $0x28] sm:$0xff]  }
  0x14   : > { %1149 = vmatmul.mubr.msk.bf16.vlgmr.msra.gmra.mrb[0].mxu1 %vm394_vm2, %v1198_v9  ;;  %1136 = vmatprep.mubr.msk.bf16.mxu0 %vm394_vm2, %v1199_v10  ;;  %v1202_v13 = vld [vmem:[%s1293_s27 + $0x58] sm:$0xff]   ;;  %v1204_v15 = vld [vmem:[%s1293_s27 + $0x60] sm:$0xff]   ;;  %v1206_v17 = vld [vmem:[%s1293_s27 + $0x68] sm:$0xff]  }
  0x15   : > { %1152 = vmatprep.mubr.msk.bf16.mxu1 %vm394_vm2, %v1200_v11  ;;  %v1207_v18 = vld [vmem:[%s1293_s27 + $0x30] sm:$0xff]   ;;  %v1209_v20 = vld [vmem:[%s1293_s27 + $0x38] sm:$0xff]  }
  0x16   : > { %v1208_v19 = vld [vmem:[%s1293_s27 + $0x70] sm:$0xff]   ;;  %v1210_v21 = vld [vmem:[%s1293_s27 + $0x78] sm:$0xff]  }
  0x1b   : > { %1137 = vmatmul.mubr.msk.bf16.gmra.mrb[4].mxu0 %vm394_vm2, %v1201_v12 }
  0x1c   : > { %1153 = vmatmul.mubr.msk.bf16.gmra.mrb[4].mxu1 %vm394_vm2, %v1202_v13  ;;  %1140 = vmatprep.mubr.msk.bf16.mxu0 %vm394_vm2, %v1203_v14 }
  0x1d   : > { %1156 = vmatprep.mubr.msk.bf16.mxu1 %vm394_vm2, %v1204_v15 }
  0x23   : > { %1141 = vmatmul.mubr.msk.bf16.gmra.mrb[8].mxu0 %vm394_vm2, %v1205_v16 }
  0x24   : > { %1157 = vmatmul.mubr.msk.bf16.gmra.mrb[8].mxu1 %vm394_vm2, %v1206_v17  ;;  %1144 = vmatprep.mubr.msk.bf16.mxu0 %vm394_vm2, %v1207_v18 }
  0x25   : > { %1160 = vmatprep.mubr.msk.bf16.mxu1 %vm394_vm2, %v1208_v19 }
  0x2b   : > { %1145 = vmatmul.mubr.msk.bf16.gmra.mrb[12].mxu0 %vm394_vm2, %v1209_v20 }
  0x2c   : > { %1161 = vmatmul.mubr.msk.bf16.gmra.mrb[12].mxu1 %vm394_vm2, %v1210_v21 }
  0xe6   : > { %v1134_v23 = vpop.f32.mrb[0].mxu0 }
  0xe7   : > { %v620_v25 = vmul.f32 %v1134_v23, %v1330_v22  ;;  %v1150_v26 = vpop.f32.mrb[0].mxu1  ;;  %v484_v27 = vpop.f32.mrb[1].mxu0 }
  0xe8   : > { %v636_v28 = vmul.f32 %v1150_v26, %v1330_v22  ;;  %v618_v29 = vmul.f32 %v1330_v22, %v484_v27  ;;  %v548_v30 = vpop.f32.mrb[1].mxu1  ;;  %v1135_v31 = vpop.f32.mrb[2].mxu0 }
  0xe9   : > { %v659_v32 = vadd.f32 %v1335_v24, %v620_v25  ;;  %v634_v33 = vmul.f32 %v1330_v22, %v548_v30  ;;  %v621_v34 = vmul.f32 %v1135_v31, %v1330_v22  ;;  %v1151_v35 = vpop.f32.mrb[2].mxu1  ;;  %v487_v36 = vpop.f32.mrb[3].mxu0 }
  0xea   : > { %v675_v37 = vadd.f32 %v1335_v24, %v636_v28  ;;  %v657_v38 = vadd.f32 %v1335_v24, %v618_v29  ;;  %v637_v39 = vmul.f32 %v1151_v35, %v1330_v22  ;;  %v619_v40 = vmul.f32 %v1330_v22, %v487_v36  ;;  %v551_v41 = vpop.f32.mrb[3].mxu1 }
  0xeb   : > { %v691_v42 = vmax.f32 %v659_v32, 0.0  ;;  %v673_v43 = vadd.f32 %v1335_v24, %v634_v33  ;;  %v660_v44 = vadd.f32 %v1335_v24, %v621_v34  ;;  %v635_v45 = vmul.f32 %v1330_v22, %v551_v41 }
  0xec   : > { %v707_v46 = vmax.f32 %v675_v37, 0.0  ;;  %v689_v47 = vmax.f32 %v657_v38, 0.0  ;;  %v676_v48 = vadd.f32 %v1335_v24, %v637_v39  ;;  %v658_v49 = vadd.f32 %v1335_v24, %v619_v40 }
  0xed   : > { %v1080_v50 = vpack.c.bf16 %v691_v42, %v691_v42  ;;  %v705_v51 = vmax.f32 %v673_v43, 0.0  ;;  %v692_v52 = vmax.f32 %v660_v44, 0.0  ;;  %v674_v53 = vadd.f32 %v1335_v24, %v635_v45 }
  0xee   : > { %v1096_v54 = vpack.c.bf16 %v707_v46, %v707_v46  ;;  %v1078_v55 = vpack.c.bf16 %v689_v47, %v689_v47  ;;  %v708_v56 = vmax.f32 %v676_v48, 0.0  ;;  %v690_v57 = vmax.f32 %v658_v49, 0.0  ;;  %v1138_v58 = vpop.f32.mrb[4].mxu0 }
  0xef   : > { %852 = vst.msk [vmem:[%s1355_s8 + $0x8] sm:$0xf] %vm849_vm3, %v1080_v50  ;;  %v1094_v59 = vpack.c.bf16 %v705_v51, %v705_v51  ;;  %v1081_v60 = vpack.c.bf16 %v692_v52, %v692_v52  ;;  %v706_v61 = vmax.f32 %v674_v53, 0.0  ;;  %v624_v62 = vmul.f32 %v1138_v58, %v1330_v22  ;;  %v1154_v63 = vpop.f32.mrb[4].mxu1  ;;  %v500_v0 = vpop.f32.mrb[5].mxu0 }
  0xf0   : > { %868 = vst.msk [vmem:[%s1355_s8 + $0x48] sm:$0xf] %vm849_vm3, %v1096_v54  ;;  %850 = vst.msk [vmem:[%s1355_s8] sm:$0xf] %vm849_vm3, %v1078_v55  ;;  %v1097_v1 = vpack.c.bf16 %v708_v56, %v708_v56  ;;  %v1079_v2 = vpack.c.bf16 %v690_v57, %v690_v57  ;;  %v640_v3 = vmul.f32 %v1154_v63, %v1330_v22  ;;  %v564_v5 = vpop.f32.mrb[5].mxu1  ;;  %v1139_v6 = vpop.f32.mrb[6].mxu0 }
  0xf1   : > { %v622_v4 = vmul.f32 %v1330_v22, %v500_v0  ;;  %866 = vst.msk [vmem:[%s1355_s8 + $0x40] sm:$0xf] %vm849_vm3, %v1094_v59  ;;  %853 = vst.msk [vmem:[%s1355_s8 + $0xc] sm:$0xf] %vm849_vm3, %v1081_v60  ;;  %v1095_v7 = vpack.c.bf16 %v706_v61, %v706_v61  ;;  %v663_v8 = vadd.f32 %v1335_v24, %v624_v62  ;;  %v1155_v11 = vpop.f32.mrb[6].mxu1  ;;  %v503_v12 = vpop.f32.mrb[7].mxu0 }
  0xf2   : > { %v638_v9 = vmul.f32 %v1330_v22, %v564_v5  ;;  %v625_v10 = vmul.f32 %v1139_v6, %v1330_v22  ;;  %869 = vst.msk [vmem:[%s1355_s8 + $0x4c] sm:$0xf] %vm849_vm3, %v1097_v1  ;;  %851 = vst.msk [vmem:[%s1355_s8 + $0x4] sm:$0xf] %vm849_vm3, %v1079_v2  ;;  %v679_v13 = vadd.f32 %v1335_v24, %v640_v3  ;;  %v567_v17 = vpop.f32.mrb[7].mxu1 }
  0xf3   : > { %v661_v14 = vadd.f32 %v1335_v24, %v622_v4  ;;  %v641_v15 = vmul.f32 %v1155_v11, %v1330_v22  ;;  %v623_v16 = vmul.f32 %v1330_v22, %v503_v12  ;;  %867 = vst.msk [vmem:[%s1355_s8 + $0x44] sm:$0xf] %vm849_vm3, %v1095_v7  ;;  %v695_v18 = vmax.f32 %v663_v8, 0.0 }
  0xf4   : > { %v677_v19 = vadd.f32 %v1335_v24, %v638_v9  ;;  %v664_v20 = vadd.f32 %v1335_v24, %v625_v10  ;;  %v639_v21 = vmul.f32 %v1330_v22, %v567_v17  ;;  %v711_v23 = vmax.f32 %v679_v13, 0.0 }
  0xf5   : > { %v693_v25 = vmax.f32 %v661_v14, 0.0  ;;  %v680_v26 = vadd.f32 %v1335_v24, %v641_v15  ;;  %v662_v27 = vadd.f32 %v1335_v24, %v623_v16  ;;  %v1084_v28 = vpack.c.bf16 %v695_v18, %v695_v18 }
  0xf6   : > { %v709_v29 = vmax.f32 %v677_v19, 0.0  ;;  %v696_v30 = vmax.f32 %v664_v20, 0.0  ;;  %v678_v31 = vadd.f32 %v1335_v24, %v639_v21  ;;  %v1100_v32 = vpack.c.bf16 %v711_v23, %v711_v23  ;;  %v1142_v36 = vpop.f32.mrb[8].mxu0 }
  0xf7   : > { %v1082_v33 = vpack.c.bf16 %v693_v25, %v693_v25  ;;  %v712_v34 = vmax.f32 %v680_v26, 0.0  ;;  %v694_v35 = vmax.f32 %v662_v27, 0.0  ;;  %856 = vst.msk [vmem:[%s1355_s8 + $0x18] sm:$0xf] %vm849_vm3, %v1084_v28  ;;  %v628_v40 = vmul.f32 %v1142_v36, %v1330_v22  ;;  %v1158_v41 = vpop.f32.mrb[8].mxu1  ;;  %v516_v42 = vpop.f32.mrb[9].mxu0 }
  0xf8   : > { %v1098_v37 = vpack.c.bf16 %v709_v29, %v709_v29  ;;  %v1085_v38 = vpack.c.bf16 %v696_v30, %v696_v30  ;;  %v710_v39 = vmax.f32 %v678_v31, 0.0  ;;  %872 = vst.msk [vmem:[%s1355_s8 + $0x58] sm:$0xf] %vm849_vm3, %v1100_v32  ;;  %v644_v45 = vmul.f32 %v1158_v41, %v1330_v22  ;;  %v580_v47 = vpop.f32.mrb[9].mxu1  ;;  %v1143_v48 = vpop.f32.mrb[10].mxu0 }
  0xf9   : > { %854 = vst.msk [vmem:[%s1355_s8 + $0x10] sm:$0xf] %vm849_vm3, %v1082_v33  ;;  %v1101_v43 = vpack.c.bf16 %v712_v34, %v712_v34  ;;  %v1083_v44 = vpack.c.bf16 %v694_v35, %v694_v35  ;;  %v626_v46 = vmul.f32 %v1330_v22, %v516_v42  ;;  %v667_v50 = vadd.f32 %v1335_v24, %v628_v40  ;;  %v1159_v53 = vpop.f32.mrb[10].mxu1  ;;  %v519_v54 = vpop.f32.mrb[11].mxu0 }
  0xfa   : > { %870 = vst.msk [vmem:[%s1355_s8 + $0x50] sm:$0xf] %vm849_vm3, %v1098_v37  ;;  %857 = vst.msk [vmem:[%s1355_s8 + $0x1c] sm:$0xf] %vm849_vm3, %v1085_v38  ;;  %v1099_v49 = vpack.c.bf16 %v710_v39, %v710_v39  ;;  %v642_v51 = vmul.f32 %v1330_v22, %v580_v47  ;;  %v629_v52 = vmul.f32 %v1143_v48, %v1330_v22  ;;  %v583_v59 = vpop.f32.mrb[11].mxu1 }
  0xfb   : > { %873 = vst.msk [vmem:[%s1355_s8 + $0x5c] sm:$0xf] %vm849_vm3, %v1101_v43  ;;  %855 = vst.msk [vmem:[%s1355_s8 + $0x14] sm:$0xf] %vm849_vm3, %v1083_v44  ;;  %v683_v55 = vadd.f32 %v1335_v24, %v644_v45  ;;  %v665_v56 = vadd.f32 %v1335_v24, %v626_v46  ;;  %v645_v57 = vmul.f32 %v1159_v53, %v1330_v22  ;;  %v699_v60 = vmax.f32 %v667_v50, 0.0 }
  0xfc   : > { %v627_v58 = vmul.f32 %v1330_v22, %v519_v54  ;;  %871 = vst.msk [vmem:[%s1355_s8 + $0x54] sm:$0xf] %vm849_vm3, %v1099_v49  ;;  %v681_v61 = vadd.f32 %v1335_v24, %v642_v51  ;;  %v668_v62 = vadd.f32 %v1335_v24, %v629_v52  ;;  %v643_v63 = vmul.f32 %v1330_v22, %v583_v59 }
  0xfd   : > { %v715_v0 = vmax.f32 %v683_v55, 0.0  ;;  %v697_v1 = vmax.f32 %v665_v56, 0.0  ;;  %v684_v2 = vadd.f32 %v1335_v24, %v645_v57  ;;  %v1088_v4 = vpack.c.bf16 %v699_v60, %v699_v60 }
  0xfe   : > { %v666_v3 = vadd.f32 %v1335_v24, %v627_v58  ;;  %v713_v5 = vmax.f32 %v681_v61, 0.0  ;;  %v700_v6 = vmax.f32 %v668_v62, 0.0  ;;  %v682_v7 = vadd.f32 %v1335_v24, %v643_v63  ;;  %v1146_v12 = vpop.f32.mrb[12].mxu0 }
  0xff   : > { %v1104_v8 = vpack.c.bf16 %v715_v0, %v715_v0  ;;  %v1086_v9 = vpack.c.bf16 %v697_v1, %v697_v1  ;;  %v716_v10 = vmax.f32 %v684_v2, 0.0  ;;  %860 = vst.msk [vmem:[%s1355_s8 + $0x28] sm:$0xf] %vm849_vm3, %v1088_v4  ;;  %v632_v16 = vmul.f32 %v1146_v12, %v1330_v22  ;;  %v1162_v17 = vpop.f32.mrb[12].mxu1  ;;  %v532_v18 = vpop.f32.mrb[13].mxu0 }
 0x100   : > { %v698_v11 = vmax.f32 %v666_v3, 0.0  ;;  %v1102_v13 = vpack.c.bf16 %v713_v5, %v713_v5  ;;  %v1089_v14 = vpack.c.bf16 %v700_v6, %v700_v6  ;;  %v714_v15 = vmax.f32 %v682_v7, 0.0  ;;  %v596_v25 = vpop.f32.mrb[13].mxu1  ;;  %v1147_v26 = vpop.f32.mrb[14].mxu0 }
 0x101   : > { %876 = vst.msk [vmem:[%s1355_s8 + $0x68] sm:$0xf] %vm849_vm3, %v1104_v8  ;;  %858 = vst.msk [vmem:[%s1355_s8 + $0x20] sm:$0xf] %vm849_vm3, %v1086_v9  ;;  %v1105_v19 = vpack.c.bf16 %v716_v10, %v716_v10  ;;  %v648_v21 = vmul.f32 %v1162_v17, %v1330_v22  ;;  %v630_v23 = vmul.f32 %v1330_v22, %v532_v18  ;;  %v1163_v31 = vpop.f32.mrb[14].mxu1  ;;  %v535_v32 = vpop.f32.mrb[15].mxu0 }
 0x102   : > { %v1087_v20 = vpack.c.bf16 %v698_v11, %v698_v11  ;;  %874 = vst.msk [vmem:[%s1355_s8 + $0x60] sm:$0xf] %vm849_vm3, %v1102_v13  ;;  %861 = vst.msk [vmem:[%s1355_s8 + $0x2c] sm:$0xf] %vm849_vm3, %v1089_v14  ;;  %v1103_v27 = vpack.c.bf16 %v714_v15, %v714_v15  ;;  %v671_v28 = vadd.f32 %v1335_v24, %v632_v16  ;;  %v599_v37 = vpop.f32.mrb[15].mxu1 }
 0x103   : > { %v646_v29 = vmul.f32 %v1330_v22, %v596_v25  ;;  %v633_v30 = vmul.f32 %v1147_v26, %v1330_v22  ;;  %877 = vst.msk [vmem:[%s1355_s8 + $0x6c] sm:$0xf] %vm849_vm3, %v1105_v19  ;;  %v687_v33 = vadd.f32 %v1335_v24, %v648_v21  ;;  %v669_v34 = vadd.f32 %v1335_v24, %v630_v23 }
 0x104   : > { %859 = vst.msk [vmem:[%s1355_s8 + $0x24] sm:$0xf] %vm849_vm3, %v1087_v20  ;;  %v649_v35 = vmul.f32 %v1163_v31, %v1330_v22  ;;  %v631_v36 = vmul.f32 %v1330_v22, %v535_v32  ;;  %875 = vst.msk [vmem:[%s1355_s8 + $0x64] sm:$0xf] %vm849_vm3, %v1103_v27  ;;  %v703_v38 = vmax.f32 %v671_v28, 0.0  ;;  %v647_v41 = vmul.f32 %v1330_v22, %v599_v37 }
 0x105   : > { %v685_v39 = vadd.f32 %v1335_v24, %v646_v29  ;;  %v672_v40 = vadd.f32 %v1335_v24, %v633_v30  ;;  %v719_v42 = vmax.f32 %v687_v33, 0.0  ;;  %v701_v43 = vmax.f32 %v669_v34, 0.0 }
 0x106   : > { %v688_v44 = vadd.f32 %v1335_v24, %v649_v35  ;;  %v670_v45 = vadd.f32 %v1335_v24, %v631_v36  ;;  %v1092_v46 = vpack.c.bf16 %v703_v38, %v703_v38  ;;  %v686_v49 = vadd.f32 %v1335_v24, %v647_v41 }
 0x107   : > { %v717_v47 = vmax.f32 %v685_v39, 0.0  ;;  %v704_v48 = vmax.f32 %v672_v40, 0.0  ;;  %v1108_v50 = vpack.c.bf16 %v719_v42, %v719_v42  ;;  %v1090_v51 = vpack.c.bf16 %v701_v43, %v701_v43 }
 0x108   : > { %v720_v22 = vmax.f32 %v688_v44, 0.0  ;;  %v702_v52 = vmax.f32 %v670_v45, 0.0  ;;  %864 = vst.msk [vmem:[%s1355_s8 + $0x38] sm:$0xf] %vm849_vm3, %v1092_v46  ;;  %v718_v55 = vmax.f32 %v686_v49, 0.0 }
 0x109   : > { %v1106_v53 = vpack.c.bf16 %v717_v47, %v717_v47  ;;  %v1093_v54 = vpack.c.bf16 %v704_v48, %v704_v48  ;;  %880 = vst.msk [vmem:[%s1355_s8 + $0x78] sm:$0xf] %vm849_vm3, %v1108_v50  ;;  %862 = vst.msk [vmem:[%s1355_s8 + $0x30] sm:$0xf] %vm849_vm3, %v1090_v51 }
 0x10a   : > { %v1109_v56 = vpack.c.bf16 %v720_v22, %v720_v22  ;;  %v1091_v57 = vpack.c.bf16 %v702_v52, %v702_v52  ;;  %v1107_v24 = vpack.c.bf16 %v718_v55, %v718_v55 }
 0x10b   : > { %878 = vst.msk [vmem:[%s1355_s8 + $0x70] sm:$0xf] %vm849_vm3, %v1106_v53  ;;  %865 = vst.msk [vmem:[%s1355_s8 + $0x3c] sm:$0xf] %vm849_vm3, %v1093_v54 }
 0x10c   : > { %881 = vst.msk [vmem:[%s1355_s8 + $0x7c] sm:$0xf] %vm849_vm3, %v1109_v56  ;;  %863 = vst.msk [vmem:[%s1355_s8 + $0x34] sm:$0xf] %vm849_vm3, %v1091_v57 }
 0x10d   : > { %879 = vst.msk [vmem:[%s1355_s8 + $0x74] sm:$0xf] %vm849_vm3, %v1107_v24 }
 0x10e PF: > { %s14_s17 = sadd.s32 1, %s1233_s17   ;;  %s1486_s15 = smov %s1229_s16 }
 0x10f   : > { %p11_p5 = scmp.ge.s32.totalorder %s14_s17, 6   ;;  %s1487_s16 = smov %s1489_s18 }
 0x111   :  { %13 = sbr.rel (!%p11_p5) target bundleno = 2 (0x2), region = 75 }

</bundles_post_ra>
